<compile_context>
chip_gen: v6e
topology: v6e:2x2x1
jax: 0.10.0
libtpu: 0.0.40
codegen_flags: <defaults>
</compile_context>

<pallas_src>
import functools

import jax
import jax.numpy as jnp
import numpy as np
from jax.experimental import pallas as pl
from jax.experimental.pallas import tpu as pltpu

LANE = 128


# -----------------------------------------------------------------------------
# Coefficient initialisation (matches get_constants_for_inits in the reference)
# -----------------------------------------------------------------------------
def get_constants_for_inits(name):
    if name == 'pade_optimized_leakyrelu':
        return [(0.0335583603, 0.505000375, 1.65343934, 2.01001052,
                 0.931901999, 0.152424124),
                (3.30847488e-06, 3.98021568, 5.12471206e-07, 0.301830109),
                (0,)]
    raise ValueError(name)


# -----------------------------------------------------------------------------
# Pallas kernel: elementwise rational function on one (tile_rows, 128) tile.
# Coefficients live in SMEM (scalar reads, read once into locals).
# -----------------------------------------------------------------------------
def _pade_kernel(wn_ref, wd_ref, x_ref, o_ref):
    # Native-dtype load; compute in f32.
    x = x_ref[...].astype(jnp.float32)

    # Read the 10 coefficients once (SMEM scalar loads).
    a0, a1, a2, a3, a4, a5 = (wn_ref[i] for i in range(6))
    b1, b2, b3, b4 = (wd_ref[i] for i in range(4))

    # Numerator P(x) via Horner, starting from a multiply (no broadcast splat).
    p = x * a5 + a4
    p = p * x + a3
    p = p * x + a2
    p = p * x + a1
    p = p * x + a0

    # Denominator poly: x*(b1 + x*(b2 + x*(b3 + x*b4)))
    q = x * b4 + b3
    q = q * x + b2
    q = q * x + b1
    q = q * x

    denom = 1.0 + jnp.abs(q)
    # EUP reciprocal (approx=False keeps accuracy within 1e-5 vs exact divide).
    out = p * pl.reciprocal(denom, approx=False)
    o_ref[...] = out.astype(o_ref.dtype)


# -----------------------------------------------------------------------------
# Wrapper: flatten -> (rows, 128) slab -> pallas_call -> reshape back
# -----------------------------------------------------------------------------
@functools.partial(jax.jit, static_argnames=("tile_rows",))
def pade_activation(x, weight_numerator, weight_denominator, tile_rows=1024):
    orig_shape = x.shape
    orig_dtype = x.dtype
    n = x.size

    rows = pl.cdiv(n, LANE)
    rows8 = pl.cdiv(rows, 8) * 8            # sublane granularity

    # Effective tile: as large as requested, multiple of 8, <= total rows.
    tr = min(tile_rows, rows8)
    tr = max(8, (tr // 8) * 8)
    # Keep >= 2 grid steps when there is enough work (v7x has 2 TensorCores).
    if tr == rows8 and rows8 >= 16 and (rows8 // 2) % 8 == 0:
        tr = rows8 // 2

    rows_padded = pl.cdiv(rows8, tr) * tr
    total = rows_padded * LANE

    xf = jnp.ravel(x)
    needs_pad = (total != n)
    if needs_pad:
        xf = jnp.pad(xf, (0, total - n))
    x2 = xf.reshape(rows_padded, LANE)

    grid = (rows_padded // tr,)

    out2 = pl.pallas_call(
        _pade_kernel,
        out_shape=jax.ShapeDtypeStruct((rows_padded, LANE), orig_dtype),
        grid=grid,
        in_specs=[
            pl.BlockSpec(memory_space=pltpu.SMEM),              # numerator coeffs
            pl.BlockSpec(memory_space=pltpu.SMEM),              # denominator coeffs
            pl.BlockSpec((tr, LANE), lambda i: (i, 0)),         # x tile
        ],
        out_specs=pl.BlockSpec((tr, LANE), lambda i: (i, 0)),
        compiler_params=pltpu.CompilerParams(
            dimension_semantics=("parallel",)),
    )(weight_numerator.astype(jnp.float32),
      weight_denominator.astype(jnp.float32),
      x2)

    if needs_pad:
        return out2.reshape(-1)[:n].reshape(orig_shape)
    return out2.reshape(orig_shape)


# -----------------------------------------------------------------------------
# Pure-JAX reference for correctness checking
# -----------------------------------------------------------------------------
def pade_reference(x, wn, wd):
    xf = x.astype(jnp.float32)
    p = jnp.zeros_like(xf)
    for i in range(len(wn) - 1, -1, -1):
        p = p * xf + wn[i]
    q = jnp.zeros_like(xf)
    for j in range(len(wd) - 1, -1, -1):
        q = q * xf + wd[j]
    q = q * xf
    return (p / (1.0 + jnp.abs(q))).astype(x.dtype)


if __name__ == "__main__":
    # Deterministic parameter init (module __init__ semantics)
    consts = get_constants_for_inits('pade_optimized_leakyrelu')
    weight_numerator = jnp.asarray(consts[0], dtype=jnp.float32)     # (6,)
    weight_denominator = jnp.asarray(consts[1], dtype=jnp.float32)   # (4,)

    key = jax.random.PRNGKey(0)

    # Small NCHW input, as a conv activation would see (even-size fast path).
    x = jax.random.normal(key, (2, 4, 16, 16), dtype=jnp.float32) * 3.0
    out = jax.block_until_ready(
        pade_activation(x, weight_numerator, weight_denominator))
    ref = pade_reference(x, np.asarray(weight_numerator), np.asarray(weight_denominator))
    np.testing.assert_allclose(np.asarray(out), np.asarray(ref), rtol=1e-5, atol=1e-5)
    assert out.shape == x.shape and out.dtype == x.dtype

    # Ragged-size input exercising the pad/slice path.
    x2 = jax.random.normal(jax.random.PRNGKey(1), (3, 5, 7, 11), dtype=jnp.float32) * 2.0
    out2 = jax.block_until_ready(
        pade_activation(x2, weight_numerator, weight_denominator))
    ref2 = pade_reference(x2, np.asarray(weight_numerator), np.asarray(weight_denominator))
    np.testing.assert_allclose(np.asarray(out2), np.asarray(ref2), rtol=1e-5, atol=1e-5)
    assert out2.shape == x2.shape and out2.dtype == x2.dtype

    print("KERNEL_OK")
</pallas_src>

<mosaic_0001>
module attributes {stable_mosaic.version = 11 : i64} {
  func.func @_pade_kernel(%arg0: i32, %arg1: memref<6xf32, #tpu.memory_space<smem>>, %arg2: memref<4xf32, #tpu.memory_space<smem>>, %arg3: memref<8x128xf32, #tpu.memory_space<vmem>>, %arg4: memref<8x128xf32, #tpu.memory_space<vmem>>) attributes {dimension_semantics = [#tpu.dimension_semantics<parallel>], iteration_bounds = array<i64: 2>, scalar_prefetch = 0 : i64, scratch_operands = 0 : i64, tpu.core_type = #tpu.core_type<tc>, window_params = [{transform_indices = @transform_0, window_bounds = array<i64: 6>}, {transform_indices = @transform_1, window_bounds = array<i64: 4>}, {transform_indices = @transform_2, window_bounds = array<i64: 8, 128>}, {transform_indices = @transform_3, window_bounds = array<i64: 8, 128>}]} {
    %c0 = arith.constant 0 : index
    %c0_0 = arith.constant 0 : index
    %0 = vector.load %arg3[%c0, %c0_0] : memref<8x128xf32, #tpu.memory_space<vmem>>, vector<8x128xf32>
    %c0_1 = arith.constant 0 : index
    %1 = memref.load %arg1[%c0_1] : memref<6xf32, #tpu.memory_space<smem>>
    %c1 = arith.constant 1 : index
    %2 = memref.load %arg1[%c1] : memref<6xf32, #tpu.memory_space<smem>>
    %c2 = arith.constant 2 : index
    %3 = memref.load %arg1[%c2] : memref<6xf32, #tpu.memory_space<smem>>
    %c3 = arith.constant 3 : index
    %4 = memref.load %arg1[%c3] : memref<6xf32, #tpu.memory_space<smem>>
    %c4 = arith.constant 4 : index
    %5 = memref.load %arg1[%c4] : memref<6xf32, #tpu.memory_space<smem>>
    %c5 = arith.constant 5 : index
    %6 = memref.load %arg1[%c5] : memref<6xf32, #tpu.memory_space<smem>>
    %c0_2 = arith.constant 0 : index
    %7 = memref.load %arg2[%c0_2] : memref<4xf32, #tpu.memory_space<smem>>
    %c1_3 = arith.constant 1 : index
    %8 = memref.load %arg2[%c1_3] : memref<4xf32, #tpu.memory_space<smem>>
    %c2_4 = arith.constant 2 : index
    %9 = memref.load %arg2[%c2_4] : memref<4xf32, #tpu.memory_space<smem>>
    %c3_5 = arith.constant 3 : index
    %10 = memref.load %arg2[%c3_5] : memref<4xf32, #tpu.memory_space<smem>>
    %11 = vector.broadcast %6 : f32 to vector<8x128xf32>
    %12 = arith.mulf %0, %11 : vector<8x128xf32>
    %13 = vector.broadcast %5 : f32 to vector<8x128xf32>
    %14 = arith.addf %12, %13 : vector<8x128xf32>
    %15 = arith.mulf %14, %0 : vector<8x128xf32>
    %16 = vector.broadcast %4 : f32 to vector<8x128xf32>
    %17 = arith.addf %15, %16 : vector<8x128xf32>
    %18 = arith.mulf %17, %0 : vector<8x128xf32>
    %19 = vector.broadcast %3 : f32 to vector<8x128xf32>
    %20 = arith.addf %18, %19 : vector<8x128xf32>
    %21 = arith.mulf %20, %0 : vector<8x128xf32>
    %22 = vector.broadcast %2 : f32 to vector<8x128xf32>
    %23 = arith.addf %21, %22 : vector<8x128xf32>
    %24 = arith.mulf %23, %0 : vector<8x128xf32>
    %25 = vector.broadcast %1 : f32 to vector<8x128xf32>
    %26 = arith.addf %24, %25 : vector<8x128xf32>
    %27 = vector.broadcast %10 : f32 to vector<8x128xf32>
    %28 = arith.mulf %0, %27 : vector<8x128xf32>
    %29 = vector.broadcast %9 : f32 to vector<8x128xf32>
    %30 = arith.addf %28, %29 : vector<8x128xf32>
    %31 = arith.mulf %30, %0 : vector<8x128xf32>
    %32 = vector.broadcast %8 : f32 to vector<8x128xf32>
    %33 = arith.addf %31, %32 : vector<8x128xf32>
    %34 = arith.mulf %33, %0 : vector<8x128xf32>
    %35 = vector.broadcast %7 : f32 to vector<8x128xf32>
    %36 = arith.addf %34, %35 : vector<8x128xf32>
    %37 = arith.mulf %36, %0 : vector<8x128xf32>
    %38 = math.absf %37 : vector<8x128xf32>
    %cst = arith.constant 1.000000e+00 : f32
    %39 = vector.broadcast %cst : f32 to vector<8x128xf32>
    %40 = arith.addf %39, %38 : vector<8x128xf32>
    %41 = tpu.reciprocal %40 : vector<8x128xf32> -> vector<8x128xf32>
    %42 = arith.mulf %26, %41 : vector<8x128xf32>
    %c0_6 = arith.constant 0 : index
    %c0_7 = arith.constant 0 : index
    %43 = vector.load %arg4[%c0_6, %c0_7] : memref<8x128xf32, #tpu.memory_space<vmem>>, vector<8x128xf32>
    tpu.vector_store %arg4[%c0_6, %c0_7], %42 {strides = array<i32>} : memref<8x128xf32, #tpu.memory_space<vmem>>, vector<8x128xf32>,
    return
  }
  func.func @transform_0(%arg0: i32) -> i32 {
    %c0_i32 = arith.constant 0 : i32
    %c0_i32_0 = arith.constant 0 : i32
    return %c0_i32 : i32
  }
  func.func @transform_1(%arg0: i32) -> i32 {
    %c0_i32 = arith.constant 0 : i32
    %c0_i32_0 = arith.constant 0 : i32
    return %c0_i32 : i32
  }
  func.func @transform_2(%arg0: i32) -> (i32, i32) {
    %c0_i32 = arith.constant 0 : i32
    %c0_i32_0 = arith.constant 0 : i32
    return %arg0, %c0_i32 : i32, i32
  }
  func.func @transform_3(%arg0: i32) -> (i32, i32) {
    %c0_i32 = arith.constant 0 : i32
    %c0_i32_0 = arith.constant 0 : i32
    return %arg0, %c0_i32 : i32, i32
  }
}

</mosaic_0001>

<bundles_post_ra>
// kernel: pade_activation.1
= control target key start
LH: loop header
LB: loop body
LE: loop exit
PB: predicated region body
PF: predicated region fallthrough
CT: control target
= control target key end

     0   :  { %8 = vsyncpa [#allocation3], 0  ;;  %s494_s0 = inlined_call_operand.vmem [shape: f32[6], index: 0, kind: input, shape index: {}]   ;;  %s495_s1 = inlined_call_operand.vmem [shape: f32[4], index: 1, kind: input, shape index: {}]   ;;  %s496_s2 = inlined_call_operand.vmem [shape: f32[16,128], index: 2, kind: input, shape index: {}]   ;;  %s497_s3 = inlined_call_operand.vmem [shape: f32[16,128], index: 3, kind: output, shape index: {}]  }
   0x1   :  { %9 = vsyncpa [#allocation5], 0  ;;  %s431_s12 = smov 0  }
   0x2 LB: > { %s437_s13 = sadd.s32 4294967295, %s407_s12   ;;  %p313_p0 = scmp.ge.s32.totalorder %s407_s12, 1  ;;  %s407_s12 = sphi %s431_s12, %s15_s12  }
   0x3   : > { %p114_p1 = scmp.lt.s32.totalorder %s407_s12, 3  ;;  %s127_s16 = sshll.u32 %s494_s0, 4  ;;  %s128_s16 = int_to_ptr.vmem [resolvable:$true] %s127_s16 }
   0x4   : > { %p498_p3 = scmp.eq.s32.totalorder %s437_s13, 0  ;;  %s138_s20 = sshll.u32 %s495_s1, 4  ;;  %s139_s20 = int_to_ptr.vmem [resolvable:$true] %s138_s20 }
   0x5   : > { %p444_p2 = pnand %p313_p0, %p114_p1  ;;  %s363_s22 = scalar_lea.vmem %s128_s16, 16 }
   0x6   : > { %p364_p6 = scmp.ne.s32.totalorder %s128_s16, %s363_s22  ;;  %p371_p10 = scmp.lt.s32.totalorder %s128_s16, %s128_s16 }
   0x7   : > { %s500_s17 = scalar_select %p444_p2, 1, 0 }
   0x8   : > { %p340_p4 = pneg %p444_p2  ;;  %p372_p11 = scmp.lt.s32.totalorder %s363_s22, %s363_s22 }
   0xa   : > { %p456_p5 = pnand %p498_p3, %p340_p4  ;;  %p373_p12 = por %p372_p11, %p371_p10 }
   0xc   : > { %p365_p7 = pneg %p456_p5 }
   0xe   : > { %p366_p8 = pnand %p365_p7, %p364_p6 }
  0x10   : > { %p367_p9 = pneg %p366_p8 }
  0x12   : > { %p374_p13 = pnand %p373_p12, %p367_p9 }
  0x14   : > { %377 = shalt.err (!%p374_p13)
}
  0x15   : > { %s409_s23 = smov [#allocation2]   ;;  %s378_s24 = scalar_lea.vmem %s139_s20, 16 }
  0x16   : > { %343 = dma.vmem_to_smem (!%p456_p5), %s128_s16, 16, %s409_s23, [#allocation3]  }
  0x17   : > { %p379_p0 = scmp.ne.s32.totalorder %s139_s20, %s378_s24  ;;  %p386_p3 = scmp.lt.s32.totalorder %s139_s20, %s139_s20 }
  0x18   : > { %p387_p2 = scmp.lt.s32.totalorder %s378_s24, %s378_s24 }
  0x19   : > { %p381_p1 = pnand %p379_p0, %p365_p7 }
  0x1a   : > { %p388_p6 = por %p387_p2, %p386_p3 }
  0x1b   : > { %p382_p4 = pneg %p381_p1 }
  0x1d   : > { %p389_p8 = pnand %p388_p6, %p382_p4 }
  0x1f   : > { %392 = shalt.err (!%p389_p8)
}
  0x20   : > { %s410_s25 = smov [#allocation4]   ;;  %p502_p9 = scmp.ne.s32.totalorder %s500_s17, 0 }
  0x21   : > { %346 = dma.vmem_to_smem (!%p456_p5), %s139_s20, 16, %s410_s25, [#allocation5]  }
  0x22   : > { %158 = sbr.rel (%p502_p9) target bundleno = 92 (0x5c), region = 32  ;;  %p503_p10 = scmp.eq.s32.totalorder (!%p502_p9), %s437_s13, 0 }
  0x27   : > { %398 = dma.done.wait (%p503_p10), [#allocation3], 16   ;;  %p504_p11 = pmov %p503_p10 }
  0x28   : > { %p505_p7 = pmov %p503_p10 }
  0x29   : > { %400 = vsyncadd (%p504_p11), [#allocation3], 4294967280 }
  0x2a   : > { %402 = dma.done.wait (%p505_p7), [#allocation5], 16   ;;  %p506_p2 = pmov %p505_p7 }
  0x2c   : > { %404 = vsyncadd (%p506_p2), [#allocation5], 4294967280 }
  0x2d   : > { %168 = sfence }
  0x2e   : > { %p185_p3 = scmp.lt.s32.totalorder %s437_s13, 1  ;;  %s325_s26 = sld [smem:[#allocation2 + $0x4]] }
  0x2f   : > { %s326_s28 = sld [smem:[#allocation2 + $0x5]] }
  0x30   : > { %s508_s13 = smov (!%p185_p3, %s437_s13), 1  ;;  %s324_s29 = sld [smem:[#allocation2 + $0x3]] }
  0x31   : > { %s320_s27 = sshll.u32 %s508_s13, 3  ;;  %s328_s6 = sld [smem:[#allocation4 + $0x2]] }
  0x32   : > { %s188_s5 = scalar_lea.vmem %s496_s2, %s320_s27  ;;  %s329_s7 = sld [smem:[#allocation4 + $0x3]] }
  0x33   : > { %v193_v0 = vld [vmem:[%s188_s5] sm:$0xff]  ;;  %s327_s8 = sld [smem:[#allocation4 + $0x1]]  ;;  %s192_s17 = scalar_lea.vmem %s497_s3, %s320_s27 }
  0x34   : > { %v206_v2 = vstv %s325_s26  ;;  %s200_s9 = sld [smem:[#allocation4]] }
  0x35   : > { %v204_v1 = vstv %s326_s28  ;;  %s323_s10 = sld [smem:[#allocation2 + $0x2]] }
  0x36   : > { %v205_v3 = vmul.f32 %v204_v1, %v193_v0  ;;  %v209_v9 = vstv %s324_s29  ;;  %s322_s11 = sld [smem:[#allocation2 + $0x1]] }
  0x37   : > { %v222_v6 = vstv %s328_s6  ;;  %s194_s14 = sld [smem:[#allocation2]] }
  0x38   : > { %v207_v4 = vadd.f32 %v206_v2, %v205_v3  ;;  %v220_v5 = vstv %s329_s7 }
  0x39   : > { %v221_v8 = vmul.f32 %v220_v5, %v193_v0  ;;  %v225_v11 = vstv %s327_s8 }
  0x3a   : > { %v208_v7 = vmul.f32 %v207_v4, %v193_v0  ;;  %v228_v15 = vstv %s200_s9 }
  0x3b   : > { %v223_v10 = vadd.f32 %v222_v6, %v221_v8  ;;  %v212_v18 = vstv %s323_s10 }
  0x3c   : > { %v210_v12 = vadd.f32 %v209_v9, %v208_v7  ;;  %v215_v25 = vstv %s322_s11 }
  0x3d   : > { %v224_v13 = vmul.f32 %v223_v10, %v193_v0  ;;  %v218_v28 = vstv %s194_s14 }
  0x3e   : > { %v211_v16 = vmul.f32 %v210_v12, %v193_v0 }
  0x3f   : > { %v226_v14 = vadd.f32 %v225_v11, %v224_v13 }
  0x40   : > { %v213_v20 = vadd.f32 %v212_v18, %v211_v16 }
  0x41   : > { %v227_v17 = vmul.f32 %v226_v14, %v193_v0 }
  0x42   : > { %v214_v23 = vmul.f32 %v213_v20, %v193_v0 }
  0x43   : > { %v229_v19 = vadd.f32 %v228_v15, %v227_v17 }
  0x44   : > { %v216_v26 = vadd.f32 %v215_v25, %v214_v23 }
  0x45   : > { %v230_v21 = vmul.f32 %v229_v19, %v193_v0 }
  0x46   : > { %v217_v27 = vmul.f32 %v216_v26, %v193_v0 }
  0x47   : > { %v231_v22 = vand.u32 2147483647, %v230_v21 }
  0x48   : > { %v219_v29 = vadd.f32 %v218_v28, %v217_v27 }
  0x49   : > { %v232_v24 = vadd.f32 1.0, %v231_v22 }
  0x4b   : > { %361 = vrcp.f32 %v232_v24 }
  0x58   : > { %v362_v30 = vpop.eup %361 }
  0x59   : > { %v234_v31 = vmul.f32 %v362_v30, %v219_v29 }
  0x5b   : > { %235 = vst [vmem:[%s192_s17] sm:$0xff] %v234_v31 }
  0x5c PF: > { %s15_s12 = sadd.s32 1, %s407_s12  }
  0x5d   : > { %p12_p5 = scmp.ge.s32.totalorder %s15_s12, 4  }
  0x5f   :  { %14 = sbr.rel (!%p12_p5) target bundleno = 2 (0x2), region = 71 }
  0x64   :  { %255 = vsyncpa [#allocation3], 1 }
  0x65   :  { %257 = vsyncpa [#allocation3 + $0x1], 1 }
  0x66   :  { %258 = vsyncpa [#allocation5], 1 }

</bundles_post_ra>
